<compile_context>
chip_gen: v5e
topology: v5e:2x2
jax: 0.10.0
libtpu: 0.0.40
codegen_flags: <defaults>
</compile_context>

<pallas_src>
import functools

import jax
import jax.numpy as jnp
from jax.experimental import pallas as pl
from jax.experimental.pallas import tpu as pltpu

_LANE = 128


def _sublane_for(dtype):
    # Minimum sublane multiple per dtype packing: f32 -> 8, bf16 -> 16, int8 -> 32.
    return {4: 8, 2: 16, 1: 32}.get(jnp.dtype(dtype).itemsize, 8)


def _l_apr_kernel(a_ref, b_ref, c_ref, d_ref, rec_ref, reg_ref, *,
                  tile_rows, total_rows, needs_mask):
    a = a_ref[...].astype(jnp.float32)
    b = b_ref[...].astype(jnp.float32)
    c = c_ref[...].astype(jnp.float32)
    d = d_ref[...].astype(jnp.float32)

    ab = a - b
    diff_rec = jnp.abs(ab)
    diff_reg = jnp.abs(ab - (c - d))

    if needs_mask:
        # Last grid tile reads past the end of the slab (unspecified data);
        # zero out rows beyond the real extent.
        t = pl.program_id(0)
        row = t * tile_rows + jax.lax.broadcasted_iota(
            jnp.int32, (tile_rows, _LANE), 0)
        valid = row < total_rows
        zero = jnp.float32(0.0)
        diff_rec = jnp.where(valid, diff_rec, zero)
        diff_reg = jnp.where(valid, diff_reg, zero)

    # Per-tile partial sums kept as an (8, 128) vector (VPU-only adds across
    # sublane groups; layout-preserving reshape). Final cross-lane/sublane
    # reduce happens in the JAX wrapper on a tiny array.
    groups = tile_rows // 8
    rec_ref[0] = jnp.sum(diff_rec.reshape(groups, 8, _LANE), axis=0)
    reg_ref[0] = jnp.sum(diff_reg.reshape(groups, 8, _LANE), axis=0)


def l_apr(f_h1_y, h2_y, h1_fy, h2_fy, reg_factor=4, tile_rows=2048):
    """Pallas implementation of L_APR.forward."""
    assert f_h1_y.shape == h2_y.shape == h1_fy.shape == h2_fy.shape
    inputs = (f_h1_y, h2_y, h1_fy, h2_fy)
    numel = f_h1_y.size

    sublane = max(_sublane_for(x.dtype) for x in inputs)
    chunk = sublane * _LANE
    pad = (-numel) % chunk  # zero-pad only if needed; zeros contribute |0-0|=0

    def to_slab(x):
        flat = x.reshape(-1)
        if pad:
            flat = jnp.pad(flat, (0, pad))
        return flat.reshape(-1, _LANE)

    slabs = [to_slab(x) for x in inputs]
    rows = slabs[0].shape[0]

    # Tile the rows axis: big enough to amortize per-step overhead (~0.35 us),
    # small enough (1 MiB f32 / buffer) to double-buffer every stream on all
    # generations (4 inputs x 2 buffers x 1 MiB = 8 MiB VMEM).
    tr = min(tile_rows, rows)
    tr = max(sublane, (tr // sublane) * sublane)
    num_tiles = pl.cdiv(rows, tr)
    needs_mask = (rows % tr) != 0

    kernel = functools.partial(
        _l_apr_kernel, tile_rows=tr, total_rows=rows, needs_mask=needs_mask)

    in_specs = [pl.BlockSpec((tr, _LANE), lambda t: (t, 0)) for _ in range(4)]
    out_specs = [pl.BlockSpec((1, 8, _LANE), lambda t: (t, 0, 0))
                 for _ in range(2)]

    rec_parts, reg_parts = pl.pallas_call(
        kernel,
        out_shape=(
            jax.ShapeDtypeStruct((num_tiles, 8, _LANE), jnp.float32),
            jax.ShapeDtypeStruct((num_tiles, 8, _LANE), jnp.float32),
        ),
        grid_spec=pltpu.PrefetchScalarGridSpec(
            num_scalar_prefetch=0,
            grid=(num_tiles,),
            in_specs=in_specs,
            out_specs=out_specs,
        ),
        compiler_params=pltpu.CompilerParams(
            # No carried state -> row-tile axis is fully parallel (megacore on v7x).
            dimension_semantics=("parallel",),
            vmem_limit_bytes=32 * 1024 * 1024,
        ),
    )(*slabs)

    inv_numel = jnp.float32(1.0) / jnp.float32(numel)
    l_rec = jnp.sum(rec_parts) * inv_numel
    l_reg = jnp.sum(reg_parts) * inv_numel
    return l_rec + jnp.float32(reg_factor) * l_reg


def l_apr_reference(f_h1_y, h2_y, h1_fy, h2_fy, reg_factor=4):
    l_rec = jnp.mean(jnp.abs(f_h1_y - h2_y))
    l_reg = jnp.mean(jnp.abs(f_h1_y - h2_y - (h1_fy - h2_fy)))
    return l_rec + reg_factor * l_reg


if __name__ == "__main__":
    key = jax.random.PRNGKey(0)
    k0, k1, k2, k3 = jax.random.split(key, 4)

    B, C, H, W = 2, 4, 16, 16
    f_h1_y = jax.random.normal(k0, (B, C, H, W), dtype=jnp.float32)
    h2_y = jax.random.normal(k1, (B, C, H, W), dtype=jnp.float32)
    h1_fy = jax.random.normal(k2, (B, C, H, W), dtype=jnp.float32)
    h2_fy = jax.random.normal(k3, (B, C, H, W), dtype=jnp.float32)

    result = l_apr(f_h1_y, h2_y, h1_fy, h2_fy, reg_factor=4)
    jax.block_until_ready(result)

    ref = l_apr_reference(f_h1_y, h2_y, h1_fy, h2_fy, reg_factor=4)
    assert jnp.allclose(result, ref, rtol=1e-5, atol=1e-5), (result, ref)

    print("KERNEL_OK")
</pallas_src>

<mosaic_0001>
module attributes {stable_mosaic.version = 11 : i64} {
  func.func @_l_apr_kernel(%arg0: i32, %arg1: memref<16x128xf32, #tpu.memory_space<vmem>>, %arg2: memref<16x128xf32, #tpu.memory_space<vmem>>, %arg3: memref<16x128xf32, #tpu.memory_space<vmem>>, %arg4: memref<16x128xf32, #tpu.memory_space<vmem>>, %arg5: memref<1x8x128xf32, #tpu.memory_space<vmem>>, %arg6: memref<1x8x128xf32, #tpu.memory_space<vmem>>) attributes {dimension_semantics = [#tpu.dimension_semantics<parallel>], iteration_bounds = array<i64: 1>, scalar_prefetch = 0 : i64, scratch_operands = 0 : i64, tpu.core_type = #tpu.core_type<tc>, window_params = [{transform_indices = @transform_0, window_bounds = array<i64: 16, 128>}, {transform_indices = @transform_1, window_bounds = array<i64: 16, 128>}, {transform_indices = @transform_2, window_bounds = array<i64: 16, 128>}, {transform_indices = @transform_3, window_bounds = array<i64: 16, 128>}, {transform_indices = @transform_4, window_bounds = array<i64: 1, 8, 128>}, {transform_indices = @transform_5, window_bounds = array<i64: 1, 8, 128>}]} {
    %c0 = arith.constant 0 : index
    %c0_0 = arith.constant 0 : index
    %0 = vector.load %arg1[%c0, %c0_0] : memref<16x128xf32, #tpu.memory_space<vmem>>, vector<16x128xf32>
    %c0_1 = arith.constant 0 : index
    %c0_2 = arith.constant 0 : index
    %1 = vector.load %arg2[%c0_1, %c0_2] : memref<16x128xf32, #tpu.memory_space<vmem>>, vector<16x128xf32>
    %c0_3 = arith.constant 0 : index
    %c0_4 = arith.constant 0 : index
    %2 = vector.load %arg3[%c0_3, %c0_4] : memref<16x128xf32, #tpu.memory_space<vmem>>, vector<16x128xf32>
    %c0_5 = arith.constant 0 : index
    %c0_6 = arith.constant 0 : index
    %3 = vector.load %arg4[%c0_5, %c0_6] : memref<16x128xf32, #tpu.memory_space<vmem>>, vector<16x128xf32>
    %4 = arith.subf %0, %1 : vector<16x128xf32>
    %5 = math.absf %4 : vector<16x128xf32>
    %6 = arith.subf %2, %3 : vector<16x128xf32>
    %7 = arith.subf %4, %6 : vector<16x128xf32>
    %8 = math.absf %7 : vector<16x128xf32>
    %9 = vector.shape_cast %5 : vector<16x128xf32> to vector<2x8x128xf32>
    %cst = arith.constant dense<0.000000e+00> : vector<8x128xf32>
    %10 = vector.multi_reduction <add>, %9, %cst [0] : vector<2x8x128xf32> to vector<8x128xf32>
    %c0_7 = arith.constant 0 : index
    %c0_8 = arith.constant 0 : index
    %c0_9 = arith.constant 0 : index
    %11 = vector.load %arg5[%c0_7, %c0_8, %c0_9] : memref<1x8x128xf32, #tpu.memory_space<vmem>>, vector<1x8x128xf32>
    %12 = vector.shape_cast %11 : vector<1x8x128xf32> to vector<8x128xf32>
    %13 = vector.shape_cast %10 : vector<8x128xf32> to vector<1x8x128xf32>
    tpu.vector_store %arg5[%c0_7, %c0_8, %c0_9], %13 {strides = array<i32>} : memref<1x8x128xf32, #tpu.memory_space<vmem>>, vector<1x8x128xf32>,
    %14 = vector.shape_cast %8 : vector<16x128xf32> to vector<2x8x128xf32>
    %cst_10 = arith.constant dense<0.000000e+00> : vector<8x128xf32>
    %15 = vector.multi_reduction <add>, %14, %cst_10 [0] : vector<2x8x128xf32> to vector<8x128xf32>
    %c0_11 = arith.constant 0 : index
    %c0_12 = arith.constant 0 : index
    %c0_13 = arith.constant 0 : index
    %16 = vector.load %arg6[%c0_11, %c0_12, %c0_13] : memref<1x8x128xf32, #tpu.memory_space<vmem>>, vector<1x8x128xf32>
    %17 = vector.shape_cast %16 : vector<1x8x128xf32> to vector<8x128xf32>
    %18 = vector.shape_cast %15 : vector<8x128xf32> to vector<1x8x128xf32>
    tpu.vector_store %arg6[%c0_11, %c0_12, %c0_13], %18 {strides = array<i32>} : memref<1x8x128xf32, #tpu.memory_space<vmem>>, vector<1x8x128xf32>,
    return
  }
  func.func @transform_0(%arg0: i32) -> (i32, i32) {
    %c0_i32 = arith.constant 0 : i32
    %c0_i32_0 = arith.constant 0 : i32
    return %arg0, %c0_i32 : i32, i32
  }
  func.func @transform_1(%arg0: i32) -> (i32, i32) {
    %c0_i32 = arith.constant 0 : i32
    %c0_i32_0 = arith.constant 0 : i32
    return %arg0, %c0_i32 : i32, i32
  }
  func.func @transform_2(%arg0: i32) -> (i32, i32) {
    %c0_i32 = arith.constant 0 : i32
    %c0_i32_0 = arith.constant 0 : i32
    return %arg0, %c0_i32 : i32, i32
  }
  func.func @transform_3(%arg0: i32) -> (i32, i32) {
    %c0_i32 = arith.constant 0 : i32
    %c0_i32_0 = arith.constant 0 : i32
    return %arg0, %c0_i32 : i32, i32
  }
  func.func @transform_4(%arg0: i32) -> (i32, i32, i32) {
    %c0_i32 = arith.constant 0 : i32
    %c0_i32_0 = arith.constant 0 : i32
    %c0_i32_1 = arith.constant 0 : i32
    return %arg0, %c0_i32, %c0_i32_0 : i32, i32, i32
  }
  func.func @transform_5(%arg0: i32) -> (i32, i32, i32) {
    %c0_i32 = arith.constant 0 : i32
    %c0_i32_0 = arith.constant 0 : i32
    %c0_i32_1 = arith.constant 0 : i32
    return %arg0, %c0_i32, %c0_i32_0 : i32, i32, i32
  }
}

</mosaic_0001>

<bundles_post_ra>
// kernel: tpu_custom_call.1
= control target key start
LH: loop header
LB: loop body
LE: loop exit
PB: predicated region body
PF: predicated region fallthrough
CT: control target
= control target key end

     0   :  { %11 = vsyncpa [#allocation3], 0  ;;  %s359_s0 = inlined_call_operand.hbm [shape: f32[16,128], index: 0, kind: input, shape index: {}]   ;;  %s360_s1 = inlined_call_operand.hbm [shape: f32[16,128], index: 1, kind: input, shape index: {}]   ;;  %s361_s2 = inlined_call_operand.hbm [shape: f32[16,128], index: 2, kind: input, shape index: {}]   ;;  %s362_s3 = inlined_call_operand.hbm [shape: f32[16,128], index: 3, kind: input, shape index: {}]   ;;  %s363_s4 = inlined_call_operand.hbm [shape: f32[1,8,128], index: 4, kind: output, shape index: {0}]   ;;  %s364_s5 = inlined_call_operand.hbm [shape: f32[1,8,128], index: 5, kind: output, shape index: {1}]  }
   0x1   :  { %12 = vsyncpa [#allocation6], 0 }
   0x2   :  { %13 = vsyncpa [#allocation9], 0 }
   0x3   :  { %14 = vsyncpa [#allocation4], 0 }
   0x4   :  { %15 = vsyncpa [#allocation12], 0  ;;  %s33_s20 = sshll.u32 %s360_s1, 4  ;;  %s303_s21 = smov [#allocation5]   ;;  %s34_s20 = int_to_ptr.hbm [resolvable:$true] %s33_s20 }
   0x5   :  { %s35_s22 = sshll.u32 %s303_s21, 4  ;;  %s20_s25 = sshll.u32 %s359_s0, 4  ;;  %s36_s22 = int_to_ptr.vmem [resolvable:$true] %s35_s22  ;;  %s21_s25 = int_to_ptr.hbm [resolvable:$true] %s20_s25 }
   0x6   :  { %s304_s26 = smov 128   ;;  %s305_s27 = smov 8  }
   0x7   :  { %41 = dma.hbm_to_vmem [thread:$0]  %s34_s20, 256, %s36_s22, [#allocation6], %s304_s26, %s304_s26, %s305_s27  }
   0x8   :  { %s306_s28 = smov [#allocation2]   ;;  %s46_s7 = sshll.u32 %s361_s2, 4  ;;  %s47_s7 = int_to_ptr.hbm [resolvable:$true] %s46_s7 }
   0x9   :  { %s22_s29 = sshll.u32 %s306_s28, 4  ;;  %s59_s9 = sshll.u32 %s362_s3, 4  ;;  %s23_s29 = int_to_ptr.vmem [resolvable:$true] %s22_s29  ;;  %s60_s9 = int_to_ptr.hbm [resolvable:$true] %s59_s9 }
   0xa   :  { %28 = dma.hbm_to_vmem [thread:$0]  %s21_s25, 256, %s23_s29, [#allocation3], %s304_s26, %s304_s26, %s305_s27  }
   0xb   :  { %s307_s10 = smov [#allocation7]   ;;  %s308_s0 = smov [#allocation8]  }
   0xc   :  { %s48_s11 = sshll.u32 %s307_s10, 4  ;;  %s61_s12 = sshll.u32 %s308_s0, 4  ;;  %s49_s11 = int_to_ptr.vmem [resolvable:$true] %s48_s11  ;;  %s62_s12 = int_to_ptr.vmem [resolvable:$true] %s61_s12 }
   0xd   :  { %54 = dma.hbm_to_vmem [thread:$0]  %s47_s7, 256, %s49_s11, [#allocation6], %s304_s26, %s304_s26, %s305_s27  }
   0xe   :  { %67 = dma.hbm_to_vmem [thread:$0]  %s60_s9, 256, %s62_s12, [#allocation9], %s304_s26, %s304_s26, %s305_s27  }
   0xf   :  { %293 = dma.done.wait [#allocation3], 256  }
  0x10   :  { %294 = vsyncadd [#allocation3], 4294967040 }
  0x11   :  { %295 = dma.done.wait [#allocation6], 512  }
  0x12   :  { %296 = vsyncadd [#allocation6], 4294966784 }
  0x13   :  { %297 = dma.done.wait [#allocation9], 256  }
  0x14   :  { %298 = vsyncadd [#allocation9], 4294967040  ;;  %v84_v0 = vld [vmem:[#allocation2] sm:$0xff]  ;;  %v85_v1 = vld [vmem:[#allocation2 + $0x8] sm:$0xff]  ;;  %s309_s2 = smov [#allocation10]   ;;  %s113_s15 = sshll.u32 %s363_s4, 4  ;;  %s114_s15 = int_to_ptr.hbm [resolvable:$true] %s113_s15 }
  0x15   :  { %v86_v2 = vld [vmem:[#allocation5] sm:$0xff]  ;;  %v87_v3 = vld [vmem:[#allocation5 + $0x8] sm:$0xff]  ;;  %v88_v5 = vld [vmem:[#allocation7] sm:$0xff]  ;;  %s111_s3 = sshll.u32 %s309_s2, 4  ;;  %s310_s16 = smov [#allocation11]   ;;  %s112_s3 = int_to_ptr.vmem [resolvable:$true] %s111_s3 }
  0x16   :  { %v92_v4 = vsub.f32 %v84_v0, %v86_v2  ;;  %v89_v6 = vld [vmem:[#allocation7 + $0x8] sm:$0xff]  ;;  %v93_v7 = vsub.f32 %v85_v1, %v87_v3  ;;  %v90_v8 = vld [vmem:[#allocation8] sm:$0xff]  ;;  %v91_v9 = vld [vmem:[#allocation8 + $0x8] sm:$0xff]  ;;  %s122_s17 = sshll.u32 %s310_s16, 4  ;;  %s124_s20 = sshll.u32 %s364_s5, 4  ;;  %s123_s17 = int_to_ptr.vmem [resolvable:$true] %s122_s17  ;;  %s125_s20 = int_to_ptr.hbm [resolvable:$true] %s124_s20 }
  0x17   :  { %v96_v11 = vsub.f32 %v88_v5, %v90_v8  ;;  %v97_v12 = vsub.f32 %v89_v6, %v91_v9 }
  0x18   :  { %v94_v10 = vand.u32 2147483647, %v92_v4  ;;  %v95_v13 = vand.u32 2147483647, %v93_v7 }
  0x19   :  { %v98_v14 = vsub.f32 %v92_v4, %v96_v11  ;;  %v99_v15 = vsub.f32 %v93_v7, %v97_v12 }
  0x1a   :  { %v102_v16 = vadd.f32 %v95_v13, %v94_v10 }
  0x1b   :  { %v100_v17 = vand.u32 2147483647, %v98_v14  ;;  %v101_v18 = vand.u32 2147483647, %v99_v15 }
  0x1c   :  { %103 = vst [vmem:[#allocation10] sm:$0xff] %v102_v16 }
  0x1d   :  { %v104_v19 = vadd.f32 %v101_v18, %v100_v17  ;;  %116 = dma.vmem_to_hbm [thread:$0]  %s112_s3, 128, %s114_s15, [#allocation4]  }
  0x1f   :  { %105 = vst [vmem:[#allocation11] sm:$0xff] %v104_v19 }
  0x20   :  { %127 = dma.vmem_to_hbm [thread:$0]  %s123_s17, 128, %s125_s20, [#allocation12]  }
  0x21   :  { %299 = dma.done.wait [#allocation4], 128  }
  0x22   :  { %300 = vsyncadd [#allocation4], 4294967168 }
  0x23   :  { %301 = dma.done.wait [#allocation12], 128  }
  0x24   :  { %302 = vsyncadd [#allocation12], 4294967168 }
  0x25   :  { %136 = vsyncpa [#allocation3], 1 }
  0x26   :  { %137 = vsyncpa [#allocation6], 1 }
  0x27   :  { %138 = vsyncpa [#allocation9], 1 }
  0x28   :  { %139 = vsyncpa [#allocation4], 1 }
  0x29   :  { %140 = vsyncpa [#allocation12], 1 }

</bundles_post_ra>
